<compile_context>
chip_gen: v6e
topology: v6e:2x2x1
jax: 0.10.0
libtpu: 0.0.40
codegen_flags: <defaults>
</compile_context>

<pallas_src>
import functools

import jax
import jax.numpy as jnp
from jax.experimental import pallas as pl
from jax.experimental.pallas import tpu as pltpu

EPS = 1e-6  # LayerNorm eps used by the AllenNLP module


# ---------------------------------------------------------------------------
# helpers
# ---------------------------------------------------------------------------
def _round_up(x, m):
    return (x + m - 1) // m * m


def _pick_row_tile(m, preferred):
    # Row tile must be a multiple of 8 (sublanes) or the full (padded) extent.
    return min(preferred, _round_up(m, 8))


def _pick_col_tile(n, preferred):
    # Full-extent blocks are always legal; otherwise use a 128-multiple tile.
    if n % preferred == 0 and preferred % 128 == 0:
        return preferred
    return n


def _drop_threshold(rate):
    # P(drop) ~= rate, as an integer threshold on uniform uint32 bits.
    return min(int(round(float(rate) * 4294967296.0)), 0xFFFFFFFF)


def _mix_bits(row_u32, col_u32, seed_u32):
    """Stateless per-element uint32 hash.  Pure jnp ops, so it lowers on
    Mosaic *and* in interpret mode, and is reproducible in plain JAX (used by
    the reference check in __main__)."""
    h = (row_u32 * jnp.uint32(0x9E3779B1)) ^ (col_u32 * jnp.uint32(0x85EBCA77))
    h = h ^ (seed_u32 * jnp.uint32(0xC2B2AE3D))
    h = h ^ (h >> 16)
    h = h * jnp.uint32(0x7FEB352D)
    h = h ^ (h >> 15)
    h = h * jnp.uint32(0x846CA68B)
    h = h ^ (h >> 16)
    return h


# ---------------------------------------------------------------------------
# Fused kernel: LayerNorm -> (x @ W + b) -> dropout -> residual, one launch
# ---------------------------------------------------------------------------
def _fused_ln_linear_residual_kernel(
    seed_ref, x_ref, w_ref, b_ref, g_ref, bt_ref, o_ref, ln_ref,
    *, hidden, tn, apply_dropout, drop_thr, inv_keep,
):
    i = pl.program_id(0)
    j = pl.program_id(1)
    tm = o_ref.shape[0]

    # --- LayerNorm prologue: once per row tile (j == 0), cached in VMEM ---
    # (x block index is (i, 0) for every j, so Pallas does not re-DMA it; the
    #  same resident slab also feeds the residual epilogue below.)
    @pl.when(j == 0)
    def _():
        xf = x_ref[...].astype(jnp.float32)
        mean = jnp.mean(xf, axis=-1, keepdims=True)
        xc = xf - mean
        # torch.Tensor.std() default: unbiased (divide by N-1), eps added to std
        var = jnp.sum(xc * xc, axis=-1, keepdims=True) * (1.0 / max(hidden - 1, 1))
        inv_std = 1.0 / (jnp.sqrt(var) + EPS)        # one divide per row, not per elem
        ln = g_ref[...] * (xc * inv_std) + bt_ref[...]
        ln_ref[...] = ln.astype(ln_ref.dtype)

    # --- sublayer: (tm, K) @ (K, tn) on the MXU, f32 accumulation ---
    y = jnp.dot(ln_ref[...], w_ref[...], preferred_element_type=jnp.float32)
    y = y + b_ref[...]

    # --- inverted dropout (training only): stateless hash, integer threshold ---
    if apply_dropout:
        row = (i * tm + jax.lax.broadcasted_iota(jnp.int32, (tm, tn), 0)).astype(jnp.uint32)
        col = (j * tn + jax.lax.broadcasted_iota(jnp.int32, (tm, tn), 1)).astype(jnp.uint32)
        bits = _mix_bits(row, col, seed_ref[0].astype(jnp.uint32))
        y = jnp.where(bits >= jnp.uint32(drop_thr), y * inv_keep, 0.0)

    # --- residual epilogue: the x columns of this output tile (already in VMEM) ---
    if tn == x_ref.shape[1]:
        x_cols = x_ref[...]
    else:
        x_cols = x_ref[:, pl.ds(j * tn, tn)]
    o_ref[...] = (x_cols.astype(jnp.float32) + y).astype(o_ref.dtype)


def sublayer_connection_linear(
    x, w, b, gamma, beta, *,
    dropout_rate=0.0, training=False, seed=0,
    row_tile=256, col_tile=256, mxu_dtype=None,
):
    """Fused SublayerConnection when the sublayer is `z @ w + b`."""
    B, S, H = x.shape
    K, N = w.shape
    assert K == H and N == H, "residual connection requires a size-preserving sublayer"
    M = B * S
    x2d = x.reshape(M, H)

    if training and dropout_rate >= 1.0:     # everything dropped -> identity residual
        return x

    tm = _pick_row_tile(M, row_tile)
    m_pad = _round_up(M, tm)
    if m_pad != M:
        x2d = jnp.pad(x2d, ((0, m_pad - M), (0, 0)))
    tn = _pick_col_tile(N, col_tile)

    if mxu_dtype is None:
        # Pass jnp.bfloat16 for large hidden sizes: ~2x MXU throughput and half
        # the W-tile DMA bytes (accumulation stays f32).
        mxu_dtype = x.dtype

    apply_dropout = bool(training) and dropout_rate > 0.0
    kernel = functools.partial(
        _fused_ln_linear_residual_kernel,
        hidden=H, tn=tn,
        apply_dropout=apply_dropout,
        drop_thr=_drop_threshold(dropout_rate),
        inv_keep=float(1.0 / (1.0 - dropout_rate)) if apply_dropout else 1.0,
    )

    seed_arr = jnp.asarray([seed], dtype=jnp.int32)
    out2d = pl.pallas_call(
        kernel,
        out_shape=jax.ShapeDtypeStruct((m_pad, N), x.dtype),
        grid_spec=pltpu.PrefetchScalarGridSpec(
            num_scalar_prefetch=1,
            grid=(m_pad // tm, N // tn),
            in_specs=[
                pl.BlockSpec((tm, H), lambda i, j, s: (i, 0)),   # x row slab (LN + residual)
                pl.BlockSpec((H, tn), lambda i, j, s: (0, j)),   # W column tile
                pl.BlockSpec((1, tn), lambda i, j, s: (0, j)),   # bias
                pl.BlockSpec((1, H), lambda i, j, s: (0, 0)),    # gamma (constant idx -> no re-DMA)
                pl.BlockSpec((1, H), lambda i, j, s: (0, 0)),    # beta
            ],
            out_specs=pl.BlockSpec((tm, tn), lambda i, j, s: (i, j)),
            scratch_shapes=[pltpu.VMEM((tm, H), mxu_dtype)],     # cached LayerNorm(x) slab
        ),
        compiler_params=pltpu.CompilerParams(
            dimension_semantics=("parallel", "arbitrary")),
    )(seed_arr, x2d, w.astype(mxu_dtype),
      b.reshape(1, N).astype(jnp.float32),
      gamma.reshape(1, H).astype(jnp.float32),
      beta.reshape(1, H).astype(jnp.float32))

    return out2d[:M].reshape(B, S, H)


# ---------------------------------------------------------------------------
# General path (arbitrary size-preserving sublayer callable)
# ---------------------------------------------------------------------------
def _layernorm_kernel(x_ref, g_ref, b_ref, o_ref, *, hidden):
    xf = x_ref[...].astype(jnp.float32)
    mean = jnp.mean(xf, axis=-1, keepdims=True)
    xc = xf - mean
    var = jnp.sum(xc * xc, axis=-1, keepdims=True) * (1.0 / max(hidden - 1, 1))
    inv_std = 1.0 / (jnp.sqrt(var) + EPS)
    o_ref[...] = (g_ref[...] * (xc * inv_std) + b_ref[...]).astype(o_ref.dtype)


def layer_norm(x2d, gamma, beta, *, row_tile=256):
    rows, hidden = x2d.shape
    tm = _pick_row_tile(rows, row_tile)
    m_pad = _round_up(rows, tm)
    xp = jnp.pad(x2d, ((0, m_pad - rows), (0, 0))) if m_pad != rows else x2d
    out = pl.pallas_call(
        functools.partial(_layernorm_kernel, hidden=hidden),
        out_shape=jax.ShapeDtypeStruct((m_pad, hidden), x2d.dtype),
        grid_spec=pltpu.PrefetchScalarGridSpec(
            num_scalar_prefetch=0,
            grid=(m_pad // tm,),
            in_specs=[
                pl.BlockSpec((tm, hidden), lambda i: (i, 0)),
                pl.BlockSpec((1, hidden), lambda i: (0, 0)),
                pl.BlockSpec((1, hidden), lambda i: (0, 0)),
            ],
            out_specs=pl.BlockSpec((tm, hidden), lambda i: (i, 0)),
        ),
        compiler_params=pltpu.CompilerParams(dimension_semantics=("parallel",)),
    )(xp,
      gamma.reshape(1, hidden).astype(jnp.float32),
      beta.reshape(1, hidden).astype(jnp.float32))
    return out[:rows]


def _residual_dropout_kernel(seed_ref, x_ref, y_ref, o_ref,
                             *, apply_dropout, drop_thr, inv_keep):
    y = y_ref[...].astype(jnp.float32)
    if apply_dropout:
        i = pl.program_id(0)
        tm, cols = o_ref.shape
        row = (i * tm + jax.lax.broadcasted_iota(jnp.int32, (tm, cols), 0)).astype(jnp.uint32)
        col = jax.lax.broadcasted_iota(jnp.int32, (tm, cols), 1).astype(jnp.uint32)
        bits = _mix_bits(row, col, seed_ref[0].astype(jnp.uint32))
        y = jnp.where(bits >= jnp.uint32(drop_thr), y * inv_keep, 0.0)
    o_ref[...] = (x_ref[...].astype(jnp.float32) + y).astype(o_ref.dtype)


def residual_add_dropout(x2d, y2d, *, dropout_rate=0.0, training=False, seed=0,
                         row_tile=256):
    rows, hidden = x2d.shape
    if training and dropout_rate >= 1.0:
        return x2d
    tm = _pick_row_tile(rows, row_tile)
    m_pad = _round_up(rows, tm)
    if m_pad != rows:
        x2d = jnp.pad(x2d, ((0, m_pad - rows), (0, 0)))
        y2d = jnp.pad(y2d, ((0, m_pad - rows), (0, 0)))
    apply_dropout = bool(training) and dropout_rate > 0.0
    seed_arr = jnp.asarray([seed], dtype=jnp.int32)
    out = pl.pallas_call(
        functools.partial(
            _residual_dropout_kernel,
            apply_dropout=apply_dropout,
            drop_thr=_drop_threshold(dropout_rate),
            inv_keep=float(1.0 / (1.0 - dropout_rate)) if apply_dropout else 1.0,
        ),
        out_shape=jax.ShapeDtypeStruct((m_pad, hidden), x2d.dtype),
        grid_spec=pltpu.PrefetchScalarGridSpec(
            num_scalar_prefetch=1,
            grid=(m_pad // tm,),
            in_specs=[
                pl.BlockSpec((tm, hidden), lambda i, s: (i, 0)),
                pl.BlockSpec((tm, hidden), lambda i, s: (i, 0)),
            ],
            out_specs=pl.BlockSpec((tm, hidden), lambda i, s: (i, 0)),
        ),
        compiler_params=pltpu.CompilerParams(dimension_semantics=("parallel",)),
    )(seed_arr, x2d, y2d)
    return out[:rows]


def sublayer_connection(x, sublayer, gamma, beta, *,
                        dropout_rate=0.0, training=False, seed=0):
    """General SublayerConnection: x + dropout(sublayer(LayerNorm(x))) for an
    arbitrary size-preserving `sublayer` callable (cannot be fused generically)."""
    B, S, H = x.shape
    x2d = x.reshape(B * S, H)
    normed = layer_norm(x2d, gamma, beta).reshape(B, S, H)
    y2d = sublayer(normed).reshape(B * S, H)
    out2d = residual_add_dropout(x2d, y2d, dropout_rate=dropout_rate,
                                 training=training, seed=seed)
    return out2d.reshape(B, S, H)


# ---------------------------------------------------------------------------
# demo / correctness check
# ---------------------------------------------------------------------------
if __name__ == "__main__":
    B, S, H = 2, 8, 32           # batch, seq, hidden ("size" of SublayerConnection)
    dropout_rate = 0.1
    seed = 1234

    key = jax.random.PRNGKey(0)
    kx, kw, kb = jax.random.split(key, 3)
    x = jax.random.normal(kx, (B, S, H), dtype=jnp.float32)

    # LayerNorm params exactly as the module initializes them.
    gamma = jnp.ones((H,), dtype=jnp.float32)
    beta = jnp.zeros((H,), dtype=jnp.float32)

    # Deterministic weights for the linear sublayer.
    w = jax.random.normal(kw, (H, H), dtype=jnp.float32) * 0.05
    b = jax.random.normal(kb, (H,), dtype=jnp.float32) * 0.05

    # ---- pure-JAX reference ----
    mean = jnp.mean(x, axis=-1, keepdims=True)
    std = jnp.std(x, axis=-1, keepdims=True, ddof=1)      # unbiased, like torch .std()
    normed_ref = gamma * (x - mean) / (std + EPS) + beta
    y_ref = normed_ref @ w + b

    # (1) fused kernel, eval mode (dropout == identity)
    out_eval = jax.block_until_ready(
        sublayer_connection_linear(x, w, b, gamma, beta,
                                   dropout_rate=dropout_rate, training=False))
    assert out_eval.shape == (B, S, H)
    assert jnp.allclose(out_eval, x + y_ref, atol=1e-4, rtol=1e-4), "eval mismatch"

    # (2) fused kernel, training mode (hash-based inverted dropout)
    # TODO(synk): torch.nn.Dropout's exact RNG stream cannot be reproduced;
    # the stateless hash gives the same Bernoulli(1-p) / (1-p)-scaling semantics.
    out_train = jax.block_until_ready(
        sublayer_connection_linear(x, w, b, gamma, beta,
                                   dropout_rate=dropout_rate, training=True,
                                   seed=seed))
    rows_idx = jnp.arange(B * S, dtype=jnp.int32).astype(jnp.uint32)[:, None]
    cols_idx = jnp.arange(H, dtype=jnp.int32).astype(jnp.uint32)[None, :]
    keep = (_mix_bits(rows_idx, cols_idx, jnp.uint32(seed))
            >= jnp.uint32(_drop_threshold(dropout_rate))).reshape(B, S, H)
    train_ref = x + jnp.where(keep, y_ref / (1.0 - dropout_rate), 0.0)
    assert jnp.allclose(out_train, train_ref, atol=1e-4, rtol=1e-4), "train mismatch"
    frac_dropped = 1.0 - float(jnp.mean(keep.astype(jnp.float32)))
    assert 0.0 < frac_dropped < 0.5, "dropout fraction implausible"

    # (3) general path with an arbitrary (non-linear) sublayer, eval mode
    sublayer_fn = lambda z: jax.nn.gelu(z @ w + b)
    out_gen = jax.block_until_ready(
        sublayer_connection(x, sublayer_fn, gamma, beta,
                            dropout_rate=dropout_rate, training=False))
    assert jnp.allclose(out_gen, x + jax.nn.gelu(y_ref), atol=1e-4, rtol=1e-4), \
        "general-path mismatch"

    print("KERNEL_OK")
</pallas_src>

<mosaic_0001>
module attributes {stable_mosaic.version = 11 : i64} {
  func.func @_fused_ln_linear_residual_kernel(%arg0: i32, %arg1: i32, %arg2: memref<1xi32, #tpu.memory_space<smem>>, %arg3: memref<16x32xf32, #tpu.memory_space<vmem>>, %arg4: memref<32x32xf32, #tpu.memory_space<vmem>>, %arg5: memref<1x32xf32, #tpu.memory_space<vmem>>, %arg6: memref<1x32xf32, #tpu.memory_space<vmem>>, %arg7: memref<1x32xf32, #tpu.memory_space<vmem>>, %arg8: memref<16x32xf32, #tpu.memory_space<vmem>>, %arg9: memref<16x32xf32, #tpu.memory_space<vmem>>) attributes {dimension_semantics = [#tpu.dimension_semantics<parallel>, #tpu.dimension_semantics<arbitrary>], iteration_bounds = array<i64: 1, 1>, scalar_prefetch = 1 : i64, scratch_operands = 1 : i64, tpu.core_type = #tpu.core_type<tc>, window_params = [{transform_indices = @transform_0, window_bounds = array<i64: 16, 32>}, {transform_indices = @transform_1, window_bounds = array<i64: 32, 32>}, {transform_indices = @transform_2, window_bounds = array<i64: 1, 32>}, {pipeline_mode = #tpu.pipeline_mode<synchronous>, transform_indices = @transform_3, window_bounds = array<i64: 1, 32>}, {pipeline_mode = #tpu.pipeline_mode<synchronous>, transform_indices = @transform_4, window_bounds = array<i64: 1, 32>}, {transform_indices = @transform_5, window_bounds = array<i64: 16, 32>}]} {
    %c0_i32 = arith.constant 0 : i32
    %0 = arith.cmpi eq, %arg1, %c0_i32 : i32
    %1 = arith.extui %0 : i1 to i32
    %c0_i32_0 = arith.constant 0 : i32
    %2 = arith.cmpi ne, %1, %c0_i32_0 : i32
    scf.if %2 {
      %c0_10 = arith.constant 0 : index
      %c0_11 = arith.constant 0 : index
      %12 = vector.load %arg3[%c0_10, %c0_11] : memref<16x32xf32, #tpu.memory_space<vmem>>, vector<16x32xf32>
      %cst_12 = arith.constant dense<0.000000e+00> : vector<16xf32>
      %13 = vector.multi_reduction <add>, %12, %cst_12 [1] : vector<16x32xf32> to vector<16xf32>
      %14 = vector.shape_cast %13 : vector<16xf32> to vector<16x1xf32>
      %cst_13 = arith.constant 3.200000e+01 : f32
      %15 = vector.broadcast %cst_13 : f32 to vector<16x1xf32>
      %16 = arith.divf %14, %15 : vector<16x1xf32>
      %17 = vector.broadcast %16 : vector<16x1xf32> to vector<16x32xf32>
      %18 = arith.subf %12, %17 : vector<16x32xf32>
      %19 = arith.mulf %18, %18 : vector<16x32xf32>
      %cst_14 = arith.constant dense<0.000000e+00> : vector<16xf32>
      %20 = vector.multi_reduction <add>, %19, %cst_14 [1] : vector<16x32xf32> to vector<16xf32>
      %21 = vector.shape_cast %20 : vector<16xf32> to vector<16x1xf32>
      %cst_15 = arith.constant 0.0322580636 : f32
      %22 = vector.broadcast %cst_15 : f32 to vector<16x1xf32>
      %23 = arith.mulf %21, %22 : vector<16x1xf32>
      %24 = math.sqrt %23 : vector<16x1xf32>
      %cst_16 = arith.constant 9.99999997E-7 : f32
      %25 = vector.broadcast %cst_16 : f32 to vector<16x1xf32>
      %26 = arith.addf %24, %25 : vector<16x1xf32>
      %cst_17 = arith.constant 1.000000e+00 : f32
      %27 = vector.broadcast %cst_17 : f32 to vector<16x1xf32>
      %28 = arith.divf %27, %26 : vector<16x1xf32>
      %c0_18 = arith.constant 0 : index
      %c0_19 = arith.constant 0 : index
      %29 = vector.load %arg6[%c0_18, %c0_19] : memref<1x32xf32, #tpu.memory_space<vmem>>, vector<1x32xf32>
      %30 = vector.broadcast %28 : vector<16x1xf32> to vector<16x32xf32>
      %31 = arith.mulf %18, %30 : vector<16x32xf32>
      %32 = vector.broadcast %29 : vector<1x32xf32> to vector<16x32xf32>
      %33 = arith.mulf %32, %31 : vector<16x32xf32>
      %c0_20 = arith.constant 0 : index
      %c0_21 = arith.constant 0 : index
      %34 = vector.load %arg7[%c0_20, %c0_21] : memref<1x32xf32, #tpu.memory_space<vmem>>, vector<1x32xf32>
      %35 = vector.broadcast %34 : vector<1x32xf32> to vector<16x32xf32>
      %36 = arith.addf %33, %35 : vector<16x32xf32>
      %c0_22 = arith.constant 0 : index
      %c0_23 = arith.constant 0 : index
      %37 = vector.load %arg9[%c0_22, %c0_23] : memref<16x32xf32, #tpu.memory_space<vmem>>, vector<16x32xf32>
      tpu.vector_store %arg9[%c0_22, %c0_23], %36 {strides = array<i32>} : memref<16x32xf32, #tpu.memory_space<vmem>>, vector<16x32xf32>,
    } else {
    }
    %c0 = arith.constant 0 : index
    %c0_1 = arith.constant 0 : index
    %3 = vector.load %arg9[%c0, %c0_1] : memref<16x32xf32, #tpu.memory_space<vmem>>, vector<16x32xf32>
    %c0_2 = arith.constant 0 : index
    %c0_3 = arith.constant 0 : index
    %4 = vector.load %arg4[%c0_2, %c0_3] : memref<32x32xf32, #tpu.memory_space<vmem>>, vector<32x32xf32>
    %cst = arith.constant dense<0.000000e+00> : vector<16x32xf32>
    %5 = tpu.matmul %3, %4, %cst {dimension_numbers = #tpu.dot_dimension_numbers<[1], [0], [0], [1], [0, 0, 1, 1], [], []>} : vector<16x32xf32>, vector<32x32xf32>, vector<16x32xf32> -> vector<16x32xf32>
    %c0_4 = arith.constant 0 : index
    %c0_5 = arith.constant 0 : index
    %6 = vector.load %arg5[%c0_4, %c0_5] : memref<1x32xf32, #tpu.memory_space<vmem>>, vector<1x32xf32>
    %7 = vector.broadcast %6 : vector<1x32xf32> to vector<16x32xf32>
    %8 = arith.addf %5, %7 : vector<16x32xf32>
    %c0_6 = arith.constant 0 : index
    %c0_7 = arith.constant 0 : index
    %9 = vector.load %arg3[%c0_6, %c0_7] : memref<16x32xf32, #tpu.memory_space<vmem>>, vector<16x32xf32>
    %10 = arith.addf %9, %8 : vector<16x32xf32>
    %c0_8 = arith.constant 0 : index
    %c0_9 = arith.constant 0 : index
    %11 = vector.load %arg8[%c0_8, %c0_9] : memref<16x32xf32, #tpu.memory_space<vmem>>, vector<16x32xf32>
    tpu.vector_store %arg8[%c0_8, %c0_9], %10 {strides = array<i32>} : memref<16x32xf32, #tpu.memory_space<vmem>>, vector<16x32xf32>,
    return
  }
  func.func @transform_0(%arg0: i32, %arg1: i32, %arg2: memref<1xi32, #tpu.memory_space<smem>>) -> (i32, i32) {
    %c0_i32 = arith.constant 0 : i32
    %c0_i32_0 = arith.constant 0 : i32
    return %arg0, %c0_i32 : i32, i32
  }
  func.func @transform_1(%arg0: i32, %arg1: i32, %arg2: memref<1xi32, #tpu.memory_space<smem>>) -> (i32, i32) {
    %c0_i32 = arith.constant 0 : i32
    %c0_i32_0 = arith.constant 0 : i32
    return %c0_i32, %arg1 : i32, i32
  }
  func.func @transform_2(%arg0: i32, %arg1: i32, %arg2: memref<1xi32, #tpu.memory_space<smem>>) -> (i32, i32) {
    %c0_i32 = arith.constant 0 : i32
    %c0_i32_0 = arith.constant 0 : i32
    return %c0_i32, %arg1 : i32, i32
  }
  func.func @transform_3(%arg0: i32, %arg1: i32, %arg2: memref<1xi32, #tpu.memory_space<smem>>) -> (i32, i32) {
    %c0_i32 = arith.constant 0 : i32
    %c0_i32_0 = arith.constant 0 : i32
    %c0_i32_1 = arith.constant 0 : i32
    return %c0_i32, %c0_i32_0 : i32, i32
  }
  func.func @transform_4(%arg0: i32, %arg1: i32, %arg2: memref<1xi32, #tpu.memory_space<smem>>) -> (i32, i32) {
    %c0_i32 = arith.constant 0 : i32
    %c0_i32_0 = arith.constant 0 : i32
    %c0_i32_1 = arith.constant 0 : i32
    return %c0_i32, %c0_i32_0 : i32, i32
  }
  func.func @transform_5(%arg0: i32, %arg1: i32, %arg2: memref<1xi32, #tpu.memory_space<smem>>) -> (i32, i32) {
    %c0_i32 = arith.constant 0 : i32
    return %arg0, %arg1 : i32, i32
  }
}

</mosaic_0001>

<bundles_post_ra>
// kernel: tpu_custom_call.1
= control target key start
LH: loop header
LB: loop body
LE: loop exit
PB: predicated region body
PF: predicated region fallthrough
CT: control target
= control target key end

     0   :  { %12 = vsyncpa [#allocation6], 0  ;;  %s428_s0 = inlined_call_operand.<no memory space> [shape: s32[1], index: 0, kind: input, shape index: {}]   ;;  %s429_s1 = inlined_call_operand.hbm [shape: f32[16,32], index: 1, kind: input, shape index: {}]   ;;  %s430_s2 = inlined_call_operand.hbm [shape: f32[32,32], index: 2, kind: input, shape index: {}]   ;;  %s431_s3 = inlined_call_operand.vmem [shape: f32[1,32], index: 3, kind: input, shape index: {}]   ;;  %s432_s4 = inlined_call_operand.vmem [shape: f32[1,32], index: 4, kind: input, shape index: {}]   ;;  %s433_s5 = inlined_call_operand.vmem [shape: f32[1,32], index: 5, kind: input, shape index: {}]   ;;  %s434_s6 = inlined_call_operand.hbm [shape: f32[16,32], index: 6, kind: output, shape index: {}]  }
   0x1   :  { %13 = vsyncpa [#allocation9], 0 }
   0x2   :  { %14 = vsyncpa [#allocation7], 0  ;;  %s341_s0 = smov [#allocation5]  }
   0x3   :  { %s20_s21 = sshll.u32 %s341_s0, 4  ;;  %s21_s21 = int_to_ptr.vmem [resolvable:$true] %s20_s21 }
   0x4   :  { %s283_s22 = scalar_lea.vmem %s21_s21, 256  ;;  %p288_p1 = scmp.lt.s32.totalorder %s21_s21, %s21_s21 }
   0x5   :  { %p284_p0 = scmp.ne.s32.totalorder %s21_s21, %s283_s22  ;;  %p289_p2 = scmp.lt.s32.totalorder %s283_s22, %s283_s22 }
   0x7   :  { %p290_p3 = por %p289_p2, %p288_p1 }
   0x9   :  { %p291_p4 = pnand %p290_p3, %p284_p0 }
   0xb   :  { %294 = shalt.err (!%p291_p4)
}
   0xc   :  { %s342_s23 = smov 128   ;;  %s343_s24 = smov 8  }
   0xd   :  { %26 = dma.hbm_to_vmem [thread:$0]  %s429_s1, 256, %s21_s21, [#allocation6], %s342_s23, %s342_s23, %s343_s24  }
   0xe   :  { %s344_s27 = smov [#allocation8]  }
   0xf   :  { %s32_s28 = sshll.u32 %s344_s27, 4  ;;  %s33_s28 = int_to_ptr.vmem [resolvable:$true] %s32_s28 }
  0x10   :  { %s303_s29 = scalar_lea.vmem %s33_s28, 512  ;;  %p308_p6 = scmp.lt.s32.totalorder %s33_s28, %s33_s28 }
  0x11   :  { %p304_p5 = scmp.ne.s32.totalorder %s33_s28, %s303_s29  ;;  %p309_p7 = scmp.lt.s32.totalorder %s303_s29, %s303_s29 }
  0x13   :  { %p310_p8 = por %p309_p7, %p308_p6 }
  0x15   :  { %p311_p9 = pnand %p310_p8, %p304_p5 }
  0x17   :  { %314 = shalt.err (!%p311_p9)
}
  0x18   :  { %38 = dma.hbm_to_vmem [thread:$0]  %s430_s2, 512, %s33_s28, [#allocation9], %s342_s23, %s342_s23, %s343_s24  }
  0x19   :  { %335 = dma.done.wait [#allocation6], 256  }
  0x1a   :  { %336 = vsyncadd [#allocation6], 4294967040 }
  0x1b   :  { %337 = dma.done.wait [#allocation9], 512  }
  0x1c   :  { %338 = vsyncadd [#allocation9], 4294966784  ;;  %vm57_vm0 = vcmask 261120   ;;  %v393_v0 = vld [vmem:[#allocation5] sm:$0xff]  ;;  %v395_v1 = vld [vmem:[#allocation5 + $0x8] sm:$0xff] }
  0x1d   :  { %v58_v2 = vsel %vm57_vm0, %v393_v0, 0.0  ;;  %v61_v3 = vsel %vm57_vm0, %v395_v1, 0.0  ;;  %v126_v14 = vld [vmem:[#allocation8 + $0x18] sm:$0xff]  ;;  %v125_v15 = vld [vmem:[#allocation8 + $0x10] sm:$0xff]  ;;  %v124_v16 = vld [vmem:[#allocation8 + $0x8] sm:$0xff] }
  0x1e   :  { %59 = vadd.xlane.f32.xlu0 %v58_v2  ;;  %251 = vmatprep.subr.mxu0 %v126_v14  ;;  %v123_v17 = vld [vmem:[#allocation8] sm:$0xff] }
  0x1f   :  { %252 = vmatpush3.msra.mxu0 %v126_v14  ;;  %v240_v35 = vld [vmem:[%s432_s4] ss:$0 sm:$0xff] }
  0x20   :  { %253 = vmatprep.subr.mxu0 %v125_v15  ;;  %v241_v37 = vld [vmem:[%s433_s5] ss:$0 sm:$0xff]  ;;  %s345_s5 = smov [#allocation10]  }
  0x21   :  { %254 = vmatpush3.msra.mxu0 %v125_v15  ;;  %v242_v46 = vld [vmem:[%s431_s3] ss:$0 sm:$0xff]  ;;  %s227_s11 = sshll.u32 %s345_s5, 4  ;;  %s228_s11 = int_to_ptr.vmem [resolvable:$true] %s227_s11 }
  0x22   :  { %62 = vadd.xlane.f32.xlu0 %v61_v3  ;;  %255 = vmatprep.subr.mxu0 %v124_v16  ;;  %s315_s12 = scalar_lea.vmem %s228_s11, 256  ;;  %p320_p11 = scmp.lt.s32.totalorder %s228_s11, %s228_s11 }
  0x23   :  { %256 = vmatpush3.msra.mxu0 %v124_v16  ;;  %p316_p10 = scmp.ne.s32.totalorder %s228_s11, %s315_s12  ;;  %p321_p12 = scmp.lt.s32.totalorder %s315_s12, %s315_s12 }
  0x24   :  { %257 = vmatprep.subr.mxu0 %v123_v17 }
  0x25   :  { %258 = vmatpush3.msra.mxu0 %v123_v17  ;;  %p322_p13 = por %p321_p12, %p320_p11 }
  0x27   :  { %p323_p0 = pnand %p322_p13, %p316_p10 }
  0xa7   :  { %v60_v4 = vpop.xlane.xlu0 %59 }
  0xa8   :  { %v65_v5 = vmul.f32 0.03125, %v60_v4 }
  0xaa   :  { %v67_v6 = vsub.f32 %v393_v0, %v65_v5 }
  0xab   :  { %v63_v7 = vpop.xlane.xlu0 %62 }
  0xac   :  { %v66_v8 = vmul.f32 0.03125, %v63_v7  ;;  %v69_v9 = vmul.f32 %v67_v6, %v67_v6 }
  0xae   :  { %v68_v10 = vsub.f32 %v395_v1, %v66_v8  ;;  %v71_v11 = vsel %vm57_vm0, %v69_v9, 0.0 }
  0xaf   :  { %72 = vadd.xlane.f32.xlu1 %v71_v11 }
  0xb0   :  { %v70_v12 = vmul.f32 %v68_v10, %v68_v10 }
  0xb2   :  { %v74_v13 = vsel %vm57_vm0, %v70_v12, 0.0 }
  0xb3   :  { %75 = vadd.xlane.f32.xlu1 %v74_v13 }
 0x138   :  { %v73_v18 = vpop.xlane.xlu1 %72 }
 0x139   :  { %v77_v19 = vmul.f32 0.032258064, %v73_v18 }
 0x13b   :  { %267 = vrsqrt.f32 %v77_v19  ;;  %vm81_vm1 = vcmp.eq.f32.partialorder %v77_v19, inf  ;;  %v84_v24 = vand.u32 2147483648, %v77_v19  ;;  %vm83_vm2 = vcmp.eq.f32.partialorder %v77_v19, 0.0 }
 0x13c   :  { %v76_v20 = vpop.xlane.xlu1 %75 }
 0x13d   :  { %v78_v21 = vmul.f32 0.032258064, %v76_v20 }
 0x13f   :  { %269 = vrsqrt.f32 %v78_v21  ;;  %vm88_vm3 = vcmp.eq.f32.partialorder %v78_v21, inf  ;;  %v91_v30 = vand.u32 2147483648, %v78_v21  ;;  %vm90_vm4 = vcmp.eq.f32.partialorder %v78_v21, 0.0 }
 0x148   :  { %v268_v22 = vpop.eup %267 }
 0x149   :  { %v80_v23 = vmul.f32 %v268_v22, %v77_v19 }
 0x14b   :  { %v82_v25 = vsel %vm81_vm1, %v77_v19, %v80_v23 }
 0x14c   :  { %v270_v26 = vpop.eup %269  ;;  %v85_v27 = vsel %vm83_vm2, %v84_v24, %v82_v25 }
 0x14d   :  { %v93_v28 = vadd.f32 1e-06, %v85_v27  ;;  %v87_v29 = vmul.f32 %v270_v26, %v78_v21 }
 0x14f   :  { %271 = vrcp.f32 %v93_v28  ;;  %v89_v31 = vsel %vm88_vm3, %v78_v21, %v87_v29 }
 0x150   :  { %v92_v32 = vsel %vm90_vm4, %v91_v30, %v89_v31 }
 0x151   :  { %v94_v33 = vadd.f32 1e-06, %v92_v32 }
 0x153   :  { %273 = vrcp.f32 %v94_v33 }
 0x15c   :  { %v272_v34 = vpop.eup %271 }
 0x15d   :  { %v100_v36 = vmul.f32 %v272_v34, %v67_v6 }
 0x15f   :  { %v108_v38 = vmul.f32 %v240_v35, %v100_v36 }
 0x160   :  { %v274_v39 = vpop.eup %273 }
 0x161   :  { %v101_v40 = vmul.f32 %v274_v39, %v68_v10  ;;  %v117_v41 = vadd.f32 %v241_v37, %v108_v38 }
 0x163   :  { %v109_v42 = vmul.f32 %v240_v35, %v101_v40  ;;  %119 = vst.msk [vmem:[#allocation2] sm:$0xff] %vm57_vm0, %v117_v41 }
 0x165   :  { %v118_v43 = vadd.f32 %v241_v37, %v109_v42 }
 0x167   :  { %120 = vst.msk [vmem:[#allocation2 + $0x8] sm:$0xff] %vm57_vm0, %v118_v43 }
 0x16a   :  { %v121_v44 = vld [vmem:[#allocation2] sm:$0xff] }
 0x16b   :  { %259 = vmatprep.mubr.msk.f32.mxu0 %vm57_vm0, %v121_v44 }
 0x16e   :  { %v122_v45 = vld [vmem:[#allocation2 + $0x8] sm:$0xff] }
 0x16f   :  { %260 = vmatmul.mubr.msk.f32.vlgmr.msra.gmra.mxu0 %vm57_vm0, %v122_v45 }
 0x22f   :  { %v261_v47 = vpop.f32.mrf.mxu0 }
 0x230   :  { %v213_v48 = vadd.f32 %v261_v47, %v242_v46 }
 0x231   :  { %v207_v49 = vpop.f32.mrf.mxu0 }
 0x232   :  { %v219_v50 = vadd.f32 %v213_v48, %v395_v1  ;;  %v208_v51 = vadd.f32 %v242_v46, %v207_v49 }
 0x234   :  { %221 = vst.msk [vmem:[#allocation10 + $0x8] sm:$0xff] %vm57_vm0, %v219_v50  ;;  %v218_v52 = vadd.f32 %v208_v51, %v393_v0 }
 0x236   :  { %220 = vst.msk [vmem:[#allocation10] sm:$0xff] %vm57_vm0, %v218_v52 }
 0x237   :  { %326 = shalt.err (!%p323_p0)
}
 0x238   :  { %233 = dma.vmem_to_hbm [thread:$0]  %s228_s11, 256, %s434_s6, [#allocation7], %s342_s23, %s342_s23, %s343_s24  }
 0x239   :  { %339 = dma.done.wait [#allocation7], 256  }
 0x23a   :  { %340 = vsyncadd [#allocation7], 4294967040 }
 0x23b   :  { %237 = vsyncpa [#allocation6], 1 }
 0x23c   :  { %238 = vsyncpa [#allocation9], 1 }
 0x23d   :  { %239 = vsyncpa [#allocation7], 1 }

</bundles_post_ra>
